<compile_context>
chip_gen: v7x
topology: tpu7x:2x2x1
jax: 0.10.0
libtpu: 0.0.40
codegen_flags: <defaults>
</compile_context>

<pallas_src>
import jax
import jax.numpy as jnp
from jax import lax
from jax.experimental import pallas as pl
from jax.experimental.pallas import tpu as pltpu


# ------------------------------ helpers ------------------------------------

def _round_up(x, m):
    return (x + m - 1) // m * m


def _padded_bytes(rows, cols, itemsize):
    """VMEM footprint of a (rows, cols) block after (sublane, 128-lane) tiling."""
    sublane = max(8, 32 // itemsize)          # 8 for f32, 16 for bf16, 32 for int8
    return _round_up(rows, sublane) * _round_up(cols, 128) * itemsize


def _choose_tiles(batch, d, itemsize, vmem_cap):
    """Pick (TB, TK) so the double-buffered x slab fits a generation-aware budget."""
    limit_cap = (3 * vmem_cap) // 4                  # ~48 MiB on v7x, ~96 MiB on v5e/v6e
    x_budget = max(8 << 20, limit_cap - (8 << 20))   # headroom for weight/out/scratch

    # K (reduction) tile: full D if tiny, else the largest mult-of-256 divisor.
    if 2 * _padded_bytes(8, d, itemsize) <= (4 << 20):
        tk = d
    else:
        tk = None
        for cand in (4096, 2048, 1024, 512, 256):
            if d % cand == 0:
                tk = cand
                break
        if tk is None:
            # TODO(synk): D has no multiple-of-256 divisor; ragged K blocks are
            # unsafe for a reduction, so fall back to a single full-D block.
            tk = d

    # Batch tile.
    if batch <= 8:
        return batch, tk                             # block == full batch dim (legal)
    # >= ~4 batch steps so v7x's two TensorCores both get work on the
    # "parallel" axis and the input/output pipeline has steps to overlap.
    tb_cap = max(8, _round_up(pl.cdiv(batch, 4), 8))
    tb = 8
    for cand in (512, 256, 128, 64, 32, 16, 8):
        if cand <= tb_cap and 2 * _padded_bytes(cand, tk, itemsize) <= x_budget:
            tb = cand
            break
    return tb, tk


def _vmem_limit_bytes(tb, tk, itemsize, vmem_cap):
    """vmem_limit computed from lane/sublane-padded block shapes."""
    limit_cap = (3 * vmem_cap) // 4
    usage = (
        2 * _padded_bytes(tb, tk, itemsize)   # double-buffered x tiles
        + 2 * _padded_bytes(2, tk, 4)         # double-buffered weight slices (f32)
        + 2 * _padded_bytes(1, 2, 4)          # bias
        + 2 * _padded_bytes(tb, 2, 4)         # output tiles
        + _padded_bytes(tb, 2, 4)             # accumulator scratch
        + (2 << 20)                           # Mosaic internal scratch slack
    )
    return int(min(limit_cap, max(4 << 20, usage)))


# ------------------------------ kernel -------------------------------------

def _ensemble_folded_kernel(x_ref, w_ref, b_ref, out_ref, acc_ref):
    # x_ref:   (TB, TK)  batch x reduction tile of flattened pixels
    # w_ref:   (2, TK)   lane-major folded ensemble+fusion weight slice (f32)
    # b_ref:   (1, 2)    folded bias (f32), resident
    # out_ref: (TB, 2)   final logits (written once, at the last K step)
    # acc_ref: (TB, 2)   f32 accumulator scratch
    k = pl.program_id(1)

    @pl.when(k == 0)
    def _():
        acc_ref[...] = jnp.zeros_like(acc_ref)

    # x @ w.T: contract the TK axis of both operands; keeping the weight
    # lane-major avoids a (D, 2) operand lane-padding to (D, 128) in VMEM.
    acc_ref[...] += lax.dot_general(
        x_ref[...], w_ref[...],
        dimension_numbers=(((1,), (1,)), ((), ())),
        preferred_element_type=jnp.float32,
    )

    @pl.when(k == pl.num_programs(1) - 1)
    def _():
        # (TB, 2) store is lane-masked; negligible vs. streaming x from HBM.
        out_ref[...] = (acc_ref[...] + b_ref[...]).astype(out_ref.dtype)


# ------------------------------ wrapper ------------------------------------

def fold_ensemble_params(model_weights, model_biases, wf, bf):
    """Exact offline folding of the linear sub-models + fusion layer.

    combined = cat_m(x @ Wm.T + bm) = x @ W_all.T + b_all   (W_all: (2M, D))
    final    = combined @ Wf.T + bf = x @ (Wf @ W_all).T + (Wf @ b_all + bf)

    Returns the folded weight LANE-MAJOR, shape (2, D).
    # TODO(synk): if real sub-models are non-linear CNNs this folding no longer
    # applies; each sub-model forward would need its own kernel(s).
    """
    w_all = jnp.concatenate([w.astype(jnp.float32) for w in model_weights], axis=0)  # (2M, D)
    b_all = jnp.concatenate([b.astype(jnp.float32) for b in model_biases], axis=0)   # (2M,)
    wf32 = wf.astype(jnp.float32)                                                    # (2, 2M)
    w_eff = wf32 @ w_all                                                             # (2, D)
    b_eff = (wf32 @ b_all + bf.astype(jnp.float32)).reshape(1, 2)                    # (1, 2)
    return w_eff, b_eff


@jax.jit
def ensemble_detector_forward(pixel_values, w_eff, b_eff):
    B = pixel_values.shape[0]
    D = w_eff.shape[1]
    # Flatten NCHW exactly like torch .view(B, -1); no extra dtype-cast pass.
    x = pixel_values.reshape(B, D)

    try:
        vmem_cap = int(pltpu.get_tpu_info().vmem_capacity_bytes)
    except Exception:
        vmem_cap = 64 << 20                   # conservative (v7x-sized) fallback

    tb, tk = _choose_tiles(B, D, x.dtype.itemsize, vmem_cap)
    # D % tk == 0 by construction; the final batch block may be ragged, which
    # is safe (garbage rows never reach HBM), so no jnp.pad copy of x is made.
    grid = (pl.cdiv(B, tb), D // tk)

    out = pl.pallas_call(
        _ensemble_folded_kernel,
        out_shape=jax.ShapeDtypeStruct((B, 2), jnp.float32),
        grid_spec=pltpu.PrefetchScalarGridSpec(
            num_scalar_prefetch=0,
            grid=grid,
            in_specs=[
                pl.BlockSpec((tb, tk), lambda i, k: (i, k)),   # streamed pixel tiles
                pl.BlockSpec((2, tk), lambda i, k: (0, k)),    # lane-major weight slice
                pl.BlockSpec((1, 2), lambda i, k: (0, 0)),     # bias, resident
            ],
            out_specs=pl.BlockSpec((tb, 2), lambda i, k: (i, 0)),
            scratch_shapes=[pltpu.VMEM((tb, 2), jnp.float32)],
        ),
        compiler_params=pltpu.CompilerParams(
            dimension_semantics=("parallel", "arbitrary"),     # batch sharded on v7x
            vmem_limit_bytes=_vmem_limit_bytes(tb, tk, x.dtype.itemsize, vmem_cap),
        ),
    )(x, w_eff, b_eff)
    return {"logits": out}


# ------------------------------ reference ----------------------------------

def _reference_forward(pixel_values, model_weights, model_biases, wf, bf):
    """Plain-JAX reference mirroring the PyTorch module literally (two-stage)."""
    B = pixel_values.shape[0]
    x_flat = pixel_values.reshape(B, -1).astype(jnp.float32)
    all_outputs = []
    for Wm, bm in zip(model_weights, model_biases):
        all_outputs.append(x_flat @ Wm.T + bm)        # each sub-model -> (B, 2)
    combined = jnp.concatenate(all_outputs, axis=1)   # (B, 2*M)
    return combined @ wf.T + bf                       # nn.Linear(2*M, 2)


if __name__ == "__main__":
    # Small shapes consistent with the module: batch=2, channels=4, spatial=16.
    B, C, H, W = 2, 4, 16, 16
    M = 3                      # number of models in the ensemble
    D = C * H * W              # flattened pixel dim per sample

    key = jax.random.PRNGKey(0)
    k_x, k_w, k_b, k_wf, k_bf = jax.random.split(key, 5)

    pixel_values = jax.random.normal(k_x, (B, C, H, W), dtype=jnp.float32)

    # Deterministic synthetic sub-model parameters (linear detectors D -> 2).
    wkeys = jax.random.split(k_w, M)
    bkeys = jax.random.split(k_b, M)
    model_weights = [
        0.02 * jax.random.normal(wkeys[m], (2, D), dtype=jnp.float32)
        for m in range(M)
    ]
    model_biases = [
        0.01 * jax.random.normal(bkeys[m], (2,), dtype=jnp.float32)
        for m in range(M)
    ]

    # Fusion layer: nn.Linear(2*M, 2)
    wf = 0.1 * jax.random.normal(k_wf, (2, 2 * M), dtype=jnp.float32)
    bf = 0.01 * jax.random.normal(k_bf, (2,), dtype=jnp.float32)

    # Offline, exact folding of ensemble + fusion into a single affine map.
    w_eff, b_eff = fold_ensemble_params(model_weights, model_biases, wf, bf)

    out = ensemble_detector_forward(pixel_values, w_eff, b_eff)
    logits = jax.block_until_ready(out["logits"])

    ref = _reference_forward(pixel_values, model_weights, model_biases, wf, bf)
    assert logits.shape == (B, 2)
    assert jnp.allclose(logits, ref, atol=1e-3, rtol=1e-3), (logits, ref)

    print("KERNEL_OK")
</pallas_src>

<mosaic_0001>
module attributes {stable_mosaic.version = 11 : i64} {
  func.func @_ensemble_folded_kernel(%arg0: i32, %arg1: i32, %arg2: memref<2x1024xf32, #tpu.memory_space<vmem>>, %arg3: memref<2x1024xf32, #tpu.memory_space<vmem>>, %arg4: memref<1x2xf32, #tpu.memory_space<vmem>>, %arg5: memref<2x2xf32, #tpu.memory_space<vmem>>, %arg6: memref<2x2xf32, #tpu.memory_space<vmem>>) attributes {dimension_semantics = [#tpu.dimension_semantics<parallel>, #tpu.dimension_semantics<arbitrary>], iteration_bounds = array<i64: 1, 1>, scalar_prefetch = 0 : i64, scratch_operands = 1 : i64, tpu.core_type = #tpu.core_type<tc>, window_params = [{transform_indices = @transform_0, window_bounds = array<i64: 2, 1024>}, {transform_indices = @transform_1, window_bounds = array<i64: 2, 1024>}, {pipeline_mode = #tpu.pipeline_mode<synchronous>, transform_indices = @transform_2, window_bounds = array<i64: 1, 2>}, {transform_indices = @transform_3, window_bounds = array<i64: 2, 2>}]} {
    %c0_i32 = arith.constant 0 : i32
    %0 = arith.cmpi eq, %arg1, %c0_i32 : i32
    %1 = arith.extui %0 : i1 to i32
    %c0_i32_0 = arith.constant 0 : i32
    %2 = arith.cmpi ne, %1, %c0_i32_0 : i32
    scf.if %2 {
      %cst_10 = arith.constant 0.000000e+00 : f32
      %12 = vector.broadcast %cst_10 : f32 to vector<2x2xf32>
      %c0_11 = arith.constant 0 : index
      %c0_12 = arith.constant 0 : index
      %13 = vector.load %arg6[%c0_11, %c0_12] : memref<2x2xf32, #tpu.memory_space<vmem>>, vector<2x2xf32>
      tpu.vector_store %arg6[%c0_11, %c0_12], %12 {strides = array<i32>} : memref<2x2xf32, #tpu.memory_space<vmem>>, vector<2x2xf32>,
    } else {
    }
    %c0 = arith.constant 0 : index
    %c0_1 = arith.constant 0 : index
    %3 = vector.load %arg6[%c0, %c0_1] : memref<2x2xf32, #tpu.memory_space<vmem>>, vector<2x2xf32>
    %c0_2 = arith.constant 0 : index
    %c0_3 = arith.constant 0 : index
    %4 = vector.load %arg2[%c0_2, %c0_3] : memref<2x1024xf32, #tpu.memory_space<vmem>>, vector<2x1024xf32>
    %c0_4 = arith.constant 0 : index
    %c0_5 = arith.constant 0 : index
    %5 = vector.load %arg3[%c0_4, %c0_5] : memref<2x1024xf32, #tpu.memory_space<vmem>>, vector<2x1024xf32>
    %cst = arith.constant dense<0.000000e+00> : vector<2x2xf32>
    %6 = tpu.matmul %4, %5, %cst {dimension_numbers = #tpu.dot_dimension_numbers<[1], [1], [0], [0], [0, 0, 1, 0], [], []>} : vector<2x1024xf32>, vector<2x1024xf32>, vector<2x2xf32> -> vector<2x2xf32>
    %7 = arith.addf %3, %6 : vector<2x2xf32>
    %c0_6 = arith.constant 0 : index
    %c0_7 = arith.constant 0 : index
    %8 = vector.load %arg6[%c0_6, %c0_7] : memref<2x2xf32, #tpu.memory_space<vmem>>, vector<2x2xf32>
    tpu.vector_store %arg6[%c0_6, %c0_7], %7 {strides = array<i32>} : memref<2x2xf32, #tpu.memory_space<vmem>>, vector<2x2xf32>,
    %c0_i32_8 = arith.constant 0 : i32
    %9 = arith.cmpi eq, %arg1, %c0_i32_8 : i32
    %10 = arith.extui %9 : i1 to i32
    %c0_i32_9 = arith.constant 0 : i32
    %11 = arith.cmpi ne, %10, %c0_i32_9 : i32
    scf.if %11 {
      %c0_10 = arith.constant 0 : index
      %c0_11 = arith.constant 0 : index
      %12 = vector.load %arg6[%c0_10, %c0_11] : memref<2x2xf32, #tpu.memory_space<vmem>>, vector<2x2xf32>
      %c0_12 = arith.constant 0 : index
      %c0_13 = arith.constant 0 : index
      %13 = vector.load %arg4[%c0_12, %c0_13] : memref<1x2xf32, #tpu.memory_space<vmem>>, vector<1x2xf32>
      %14 = vector.broadcast %13 : vector<1x2xf32> to vector<2x2xf32>
      %15 = arith.addf %12, %14 : vector<2x2xf32>
      %c0_14 = arith.constant 0 : index
      %c0_15 = arith.constant 0 : index
      %16 = vector.load %arg5[%c0_14, %c0_15] : memref<2x2xf32, #tpu.memory_space<vmem>>, vector<2x2xf32>
      tpu.vector_store %arg5[%c0_14, %c0_15], %15 {strides = array<i32>} : memref<2x2xf32, #tpu.memory_space<vmem>>, vector<2x2xf32>,
    } else {
    }
    return
  }
  func.func @transform_0(%arg0: i32, %arg1: i32) -> (i32, i32) {
    %c0_i32 = arith.constant 0 : i32
    return %arg0, %arg1 : i32, i32
  }
  func.func @transform_1(%arg0: i32, %arg1: i32) -> (i32, i32) {
    %c0_i32 = arith.constant 0 : i32
    %c0_i32_0 = arith.constant 0 : i32
    return %c0_i32, %arg1 : i32, i32
  }
  func.func @transform_2(%arg0: i32, %arg1: i32) -> (i32, i32) {
    %c0_i32 = arith.constant 0 : i32
    %c0_i32_0 = arith.constant 0 : i32
    %c0_i32_1 = arith.constant 0 : i32
    return %c0_i32, %c0_i32_0 : i32, i32
  }
  func.func @transform_3(%arg0: i32, %arg1: i32) -> (i32, i32) {
    %c0_i32 = arith.constant 0 : i32
    %c0_i32_0 = arith.constant 0 : i32
    return %arg0, %c0_i32 : i32, i32
  }
}

</mosaic_0001>

<bundles_post_ra>
// kernel: ensemble_detector_forward.1
= control target key start
LH: loop header
LB: loop body
LE: loop exit
PB: predicated region body
PF: predicated region fallthrough
CT: control target
= control target key end

     0   :  { %v32_v1 = vlaneseq  ;;  %v456_v3 = vmov 1983009808   ;;  %s509_s0 = inlined_call_operand.vmem [shape: f32[2,1024], index: 0, kind: input, shape index: {}]   ;;  %s510_s1 = inlined_call_operand.vmem [shape: f32[2,1024], index: 1, kind: input, shape index: {}]   ;;  %s511_s2 = inlined_call_operand.vmem [shape: f32[1,2], index: 2, kind: input, shape index: {}]   ;;  %s512_s3 = inlined_call_operand.hbm [shape: f32[2,2], index: 3, kind: output, shape index: {}]  }
   0x1   :  { %v24_v0 = vld [vmem:[%s510_s1] sm:$0xff]  ;;  %v30_v4 = vunpack.c.l.s4 %v456_v3  ;;  %v25_v5 = vld [vmem:[%s510_s1 + $0x8] sm:$0xff] }
   0x2   :  { %v22_v2 = vld [vmem:[%s509_s0] sm:$0xff]  ;;  %v23_v6 = vld [vmem:[%s509_s0 + $0x8] sm:$0xff] }
   0x3   :  { %8 = vsyncpa [#allocation4], 0  ;;  %v33_v7 = vshrl.u32 %v32_v1, 7  ;;  %v31_v8 = vunpack.c.0.s8 %v30_v4  ;;  %v72_v9 = vcombine.high %v24_v0, %v24_v0  ;;  %v28_v10 = vcombine.high %v22_v2, %v22_v2  ;;  %v424_v44 = vld [vmem:[%s511_s2] ss:$0 sm:$0xff]  ;;  %s458_s20 = smov [#allocation3]  }
   0x4   :  { %v89_v11 = vcombine.high %v25_v5, %v25_v5  ;;  %v45_v12 = vcombine.high %v23_v6, %v23_v6  ;;  %vm19_vm0 = vcmask 9216   ;;  %v457_v30 = vmov 0.0   ;;  %s416_s21 = sshll.u32 %s458_s20, 4  ;;  %s417_s21 = int_to_ptr.vmem [resolvable:$true] %s416_s21 }
   0x5   :  { %v34_v13 = vsub.s32 %v31_v8, %v33_v7  ;;  %20 = vst.msk [vmem:[#allocation2] sm:$0x3] %vm19_vm0, %v457_v30  ;;  %s432_s22 = scalar_lea.vmem %s417_s21, 32  ;;  %p437_p1 = scmp.lt.s32.totalorder %s417_s21, %s417_s21 }
   0x6   :  { %p433_p0 = scmp.ne.s32.totalorder %s417_s21, %s432_s22  ;;  %p438_p2 = scmp.lt.s32.totalorder %s432_s22, %s432_s22 }
   0x7   :  { %v79_v14 = vrot.slane %v24_v0, %v34_v13  ;;  %v86_v15 = vrot.slane %v72_v9, %v34_v13  ;;  %v35_v16 = vrot.slane %v22_v2, %v34_v13  ;;  %v42_v17 = vrot.slane %v28_v10, %v34_v13 }
   0x8   :  { %v96_v18 = vrot.slane %v25_v5, %v34_v13  ;;  %v103_v19 = vrot.slane %v89_v11, %v34_v13  ;;  %v52_v20 = vrot.slane %v23_v6, %v34_v13  ;;  %v59_v21 = vrot.slane %v45_v12, %v34_v13  ;;  %p439_p3 = por %p438_p2, %p437_p1 }
   0x9   :  { %v87_v22 = vcombine.high %v79_v14, %v79_v14  ;;  %v88_v23 = vcombine.high %v86_v15, %v86_v15  ;;  %v43_v24 = vcombine.high %v35_v16, %v35_v16  ;;  %v44_v25 = vcombine.high %v42_v17, %v42_v17 }
   0xa   :  { %v104_v26 = vcombine.high %v96_v18, %v96_v18  ;;  %v105_v27 = vcombine.high %v103_v19, %v103_v19  ;;  %v60_v28 = vcombine.high %v52_v20, %v52_v20  ;;  %v61_v29 = vcombine.high %v59_v21, %v59_v21  ;;  %p440_p4 = pnand %p439_p3, %p433_p0 }
   0xb   :  { %114 = vmatprep.subr.mxu0 %v87_v22  ;;  %184 = vmatprep.subr.mxu1 %v88_v23 }
   0xc   :  { %115 = vmatpush1.xpose.msra.mxu0 %v79_v14  ;;  %185 = vmatpush1.xpose.msra.mxu1 %v86_v15  ;;  %v21_v40 = vld [vmem:[#allocation2] sm:$0x3] }
   0xd   :  { %178 = vmatprep.mubr.f32.mxu0 %v43_v24  ;;  %248 = vmatprep.mubr.f32.mxu1 %v44_v25 }
   0xe   :  { %254 = vmatprep.subr.mxu0 %v104_v26  ;;  %324 = vmatprep.subr.mxu1 %v105_v27 }
   0xf   :  { %179 = vmatmul.mubr.f32.vlgmr.msra.gmra.mrb[0].mxu0 %v35_v16  ;;  %249 = vmatmul.mubr.f32.vlgmr.msra.gmra.mrb[0].mxu1 %v42_v17 }
  0x10   :  { %255 = vmatpush1.xpose.msra.mxu0 %v96_v18  ;;  %318 = vmatprep.mubr.f32.mxu0 %v60_v28 }
  0x11   :  { %325 = vmatpush1.xpose.msra.mxu1 %v103_v19  ;;  %388 = vmatprep.mubr.f32.mxu1 %v61_v29 }
  0x13   :  { %319 = vmatmul.mubr.f32.vlgmr.msra.gmra.mrb[2].mxu0 %v52_v20 }
  0x14   :  { %389 = vmatmul.mubr.f32.vlgmr.msra.gmra.mrb[2].mxu1 %v59_v21 }
  0xe2   :  { %v180_v31 = vpop.f32.mrb[0].mxu0  ;;  %v250_v32 = vpop.f32.mrb[0].mxu1 }
  0xe3   :  { %v182_v33 = vpop.f32.mrb[1].mxu0  ;;  %v251_v34 = vadd.f32 %v250_v32, %v180_v31  ;;  %v252_v35 = vpop.f32.mrb[1].mxu1 }
  0xe6   :  { %v320_v36 = vpop.f32.mrb[2].mxu0 }
  0xe7   :  { %v321_v37 = vadd.f32 %v320_v36, %v251_v34  ;;  %v322_v38 = vpop.f32.mrb[3].mxu0  ;;  %v390_v39 = vpop.f32.mrb[2].mxu1 }
  0xe8   :  { %v392_v41 = vpop.f32.mrb[3].mxu1 }
  0xe9   :  { %v391_v42 = vadd.f32 %v390_v39, %v321_v37 }
  0xeb   :  { %v394_v43 = vadd.f32 %v391_v42, %v21_v40 }
  0xed   :  { %396 = vst.msk [vmem:[#allocation2] sm:$0x3] %vm19_vm0, %v394_v43 }
  0xf4   :  { %v400_v45 = vld [vmem:[#allocation2] sm:$0x3] }
  0xf5   :  { %v408_v46 = vadd.f32 %v424_v44, %v400_v45 }
  0xf7   :  { %409 = vst.msk [vmem:[#allocation3] sm:$0x3] %vm19_vm0, %v408_v46 }
  0xf8   :  { %443 = shalt.err (!%p440_p4)
}
  0xf9   :  { %s444_s25 = scalar_lea.hbm %s512_s3, 32 }
  0xfa   :  { %p445_p5 = scmp.ne.s32.totalorder %s512_s3, %s444_s25  ;;  %p448_p6 = scmp.lt.u32.totalorder %s444_s25, %s512_s3 }
  0xfc   :  { %p450_p7 = pnand %p448_p6, %p445_p5 }
  0xfe   :  { %453 = shalt.err (!%p450_p7)
}
  0xff   :  { %419 = dma.vmem_to_hbm [thread:$0]  %s417_s21, 32, %s512_s3, [#allocation4]  }
 0x100   :  { %454 = dma.done.wait [#allocation4], 32  }
 0x101   :  { %455 = vsyncadd [#allocation4], 4294967264 }
 0x102   :  { %423 = vsyncpa [#allocation4], 1 }

</bundles_post_ra>
